<compile_context>
chip_gen: v7x
topology: tpu7x:2x2x1
jax: 0.10.0
libtpu: 0.0.40
codegen_flags: <defaults>
</compile_context>

<pallas_src>
import jax
import jax.numpy as jnp
from jax import lax
from jax.experimental import pallas as pl
from jax.experimental.pallas import tpu as pltpu


def _round_up(x: int, m: int) -> int:
    return ((x + m - 1) // m) * m


def _cdiv(a: int, b: int) -> int:
    return (a + b - 1) // b


def _mlp_kernel(x_ref, w1_ref, b1_ref, w2_ref, b2_ref, w3_ref, b3_ref, o_ref):
    """One batch tile of the MLP forward (batch-on-lanes internally).

    x_ref : [TB, d_ff]        streamed batch tile, native layout
    w1_ref: [hidden, d_ff]    resident in VMEM
    b1_ref: [hidden, 1]       resident
    w2_ref: [n_vars, hidden]  resident
    b2_ref: [n_vars, 1]       resident
    w3_ref: [n_vars, 1]       resident
    b3_ref: [1, 1]            resident
    o_ref : [1, TB]           lane-dense output tile
    """
    # fc_1 on the MXU: contract d_ff of w1 with d_ff of the x tile.
    # Result is [hidden, TB] with the batch on the 128-wide lane axis.
    h1 = lax.dot_general(
        w1_ref[...], x_ref[...],
        dimension_numbers=(((1,), (1,)), ((), ())),
        preferred_element_type=jnp.float32)
    h1 = jnp.maximum(h1 + b1_ref[...], 0.0)                      # [hidden, TB]

    # fc_2: single pass over h1 (tiny M/K matmul) -> [n_vars, TB]
    h2 = lax.dot_general(
        w2_ref[...], h1,
        dimension_numbers=(((1,), (0,)), ((), ())),
        preferred_element_type=jnp.float32)
    h2 = jnp.maximum(h2 + b2_ref[...], 0.0)                      # [n_vars, TB]

    # fc_3: weighted sublane reduce over the n_vars rows (XLU) -> [1, TB]
    z = jnp.sum(w3_ref[...] * h2, axis=0, keepdims=True) + b3_ref[...]

    # Numerically stable sigmoid; exp goes to the EUP slot.
    ez = jnp.exp(-jnp.abs(z))
    inv = 1.0 / (1.0 + ez)
    o_ref[...] = jnp.where(z >= 0.0, inv, ez * inv)


def mlp_pallas(x, w1, b1, w2, b2, w3, b3, *, block_b: int = 4096):
    """MLP forward.

    PyTorch nn.Linear parameter layout:
      x : [B, d_ff]
      w1: [hidden, d_ff],      b1: [hidden]
      w2: [num_vars, hidden],  b2: [num_vars]
      w3: [1, num_vars],       b3: [1]
    Returns [B, 1] float32 (same as the nn.Module forward).
    """
    B, d_ff = x.shape
    hidden = w1.shape[0]
    num_vars = w2.shape[0]

    # Stream x in its own dtype (bf16 callers keep half the HBM traffic);
    # anything that is neither bf16 nor f32 is normalized to f32.
    if x.dtype != jnp.bfloat16 and x.dtype != jnp.float32:
        x = x.astype(jnp.float32)
    x_dtype = x.dtype

    # Pad the batch only up to a multiple of 128 lanes (never to a whole tile).
    B128 = _round_up(max(B, 1), 128)
    if B128 != B:
        x = jnp.pad(x, ((0, B128 - B), (0, 0)))

    # Batch tile: as large as requested, but keep >= 2 grid steps when the
    # batch allows, so the "parallel" axis shards across both v7x TensorCores.
    tb = min(block_b, B128)
    if B128 // tb < 2 and B128 >= 256:
        tb = _round_up(_cdiv(B128, 2), 128)
    grid = (_cdiv(B128, tb),)

    w1c = w1.astype(x_dtype)                                # [hidden, d_ff] (MXU lhs)
    b1c = b1.astype(jnp.float32).reshape(hidden, 1)
    w2c = w2.astype(jnp.float32)                            # [num_vars, hidden]
    b2c = b2.astype(jnp.float32).reshape(num_vars, 1)
    w3c = w3.astype(jnp.float32).reshape(num_vars, 1)
    b3c = b3.astype(jnp.float32).reshape(1, 1)

    # Constant index_map -> weights stay resident in VMEM (fetched once).
    resident = lambda shape: pl.BlockSpec(shape, lambda i: (0, 0))

    itemsize = jnp.dtype(x_dtype).itemsize
    cost = pl.CostEstimate(
        flops=2 * B128 * (d_ff * hidden + hidden * num_vars + num_vars),
        transcendentals=B128,
        bytes_accessed=B128 * d_ff * itemsize + B128 * 4,
    )

    oT = pl.pallas_call(
        _mlp_kernel,
        out_shape=jax.ShapeDtypeStruct((1, B128), jnp.float32),
        grid=grid,
        in_specs=[
            pl.BlockSpec((tb, d_ff), lambda i: (i, 0)),     # streamed x tile
            resident((hidden, d_ff)),                        # w1
            resident((hidden, 1)),                           # b1
            resident((num_vars, hidden)),                    # w2
            resident((num_vars, 1)),                         # b2
            resident((num_vars, 1)),                         # w3
            resident((1, 1)),                                # b3
        ],
        out_specs=pl.BlockSpec((1, tb), lambda i: (0, i)),   # lane-dense output
        compiler_params=pltpu.CompilerParams(
            dimension_semantics=("parallel",)),
        cost_estimate=cost,
    )(x, w1c, b1c, w2c, b2c, w3c, b3c)

    return oT[0, :B].reshape(B, 1)


if __name__ == "__main__":
    d_ff = 32
    hidden_size = 32
    num_variables = 4

    key = jax.random.PRNGKey(0)
    kx, kw1, kb1, kw2, kb2, kw3, kb3, kx2 = jax.random.split(key, 8)

    def uinit(k, shape, fan_in):
        bound = 1.0 / (fan_in ** 0.5)
        return jax.random.uniform(k, shape, jnp.float32, -bound, bound)

    # PyTorch nn.Linear layout: W [out, in], b [out].
    w1 = uinit(kw1, (hidden_size, d_ff), d_ff)
    b1 = uinit(kb1, (hidden_size,), d_ff)
    w2 = uinit(kw2, (num_variables, hidden_size), hidden_size)
    b2 = uinit(kb2, (num_variables,), hidden_size)
    w3 = uinit(kw3, (1, num_variables), num_variables)
    b3 = uinit(kb3, (1,), num_variables)

    def reference(xx):
        h1 = jnp.maximum(xx @ w1.T + b1, 0.0)
        h2 = jnp.maximum(h1 @ w2.T + b2, 0.0)
        return jax.nn.sigmoid(h2 @ w3.T + b3)

    # Case 1: tiny batch (single 128-lane tile).
    # Case 2: non-128-aligned batch -> exercises the pad-to-128 path and the
    #         2-step grid (both TensorCores on v7x), with exact block division.
    for B, k in ((8, kx), (200, kx2)):
        x = jax.random.normal(k, (B, d_ff), jnp.float32)
        out = jax.block_until_ready(mlp_pallas(x, w1, b1, w2, b2, w3, b3))
        ref = reference(x)
        assert out.shape == (B, 1), f"bad shape {out.shape} at B={B}"
        err = float(jnp.max(jnp.abs(out - ref)))
        assert jnp.allclose(out, ref, atol=2e-5, rtol=2e-5), \
            f"max abs err {err} at B={B}"

    print("KERNEL_OK")
</pallas_src>

<mosaic_0001>
module attributes {stable_mosaic.version = 11 : i64} {
  func.func @_mlp_kernel(%arg0: i32, %arg1: memref<128x32xf32, #tpu.memory_space<vmem>>, %arg2: memref<32x32xf32, #tpu.memory_space<vmem>>, %arg3: memref<32x1xf32, #tpu.memory_space<vmem>>, %arg4: memref<4x32xf32, #tpu.memory_space<vmem>>, %arg5: memref<4x1xf32, #tpu.memory_space<vmem>>, %arg6: memref<4x1xf32, #tpu.memory_space<vmem>>, %arg7: memref<1x1xf32, #tpu.memory_space<vmem>>, %arg8: memref<1x128xf32, #tpu.memory_space<vmem>>) attributes {dimension_semantics = [#tpu.dimension_semantics<parallel>], iteration_bounds = array<i64: 1>, scalar_prefetch = 0 : i64, scratch_operands = 0 : i64, tpu.core_type = #tpu.core_type<tc>, window_params = [{transform_indices = @transform_0, window_bounds = array<i64: 128, 32>}, {pipeline_mode = #tpu.pipeline_mode<synchronous>, transform_indices = @transform_1, window_bounds = array<i64: 32, 32>}, {pipeline_mode = #tpu.pipeline_mode<synchronous>, transform_indices = @transform_2, window_bounds = array<i64: 32, 1>}, {pipeline_mode = #tpu.pipeline_mode<synchronous>, transform_indices = @transform_3, window_bounds = array<i64: 4, 32>}, {pipeline_mode = #tpu.pipeline_mode<synchronous>, transform_indices = @transform_4, window_bounds = array<i64: 4, 1>}, {pipeline_mode = #tpu.pipeline_mode<synchronous>, transform_indices = @transform_5, window_bounds = array<i64: 4, 1>}, {pipeline_mode = #tpu.pipeline_mode<synchronous>, transform_indices = @transform_6, window_bounds = array<i64: 1, 1>}, {transform_indices = @transform_7, window_bounds = array<i64: 1, 128>}]} {
    %c0 = arith.constant 0 : index
    %c0_0 = arith.constant 0 : index
    %0 = vector.load %arg2[%c0, %c0_0] : memref<32x32xf32, #tpu.memory_space<vmem>>, vector<32x32xf32>
    %c0_1 = arith.constant 0 : index
    %c0_2 = arith.constant 0 : index
    %1 = vector.load %arg1[%c0_1, %c0_2] : memref<128x32xf32, #tpu.memory_space<vmem>>, vector<128x32xf32>
    %cst = arith.constant dense<0.000000e+00> : vector<32x128xf32>
    %2 = tpu.matmul %0, %1, %cst {dimension_numbers = #tpu.dot_dimension_numbers<[1], [1], [0], [0], [0, 0, 1, 0], [], []>} : vector<32x32xf32>, vector<128x32xf32>, vector<32x128xf32> -> vector<32x128xf32>
    %c0_3 = arith.constant 0 : index
    %c0_4 = arith.constant 0 : index
    %3 = vector.load %arg3[%c0_3, %c0_4] : memref<32x1xf32, #tpu.memory_space<vmem>>, vector<32x1xf32>
    %4 = vector.broadcast %3 : vector<32x1xf32> to vector<32x128xf32>
    %5 = arith.addf %2, %4 : vector<32x128xf32>
    %cst_5 = arith.constant 0.000000e+00 : f32
    %6 = vector.broadcast %cst_5 : f32 to vector<32x128xf32>
    %7 = arith.maximumf %5, %6 : vector<32x128xf32>
    %c0_6 = arith.constant 0 : index
    %c0_7 = arith.constant 0 : index
    %8 = vector.load %arg4[%c0_6, %c0_7] : memref<4x32xf32, #tpu.memory_space<vmem>>, vector<4x32xf32>
    %cst_8 = arith.constant dense<0.000000e+00> : vector<4x128xf32>
    %9 = tpu.matmul %8, %7, %cst_8 {dimension_numbers = #tpu.dot_dimension_numbers<[1], [0], [0], [1], [0, 0, 1, 1], [], []>} : vector<4x32xf32>, vector<32x128xf32>, vector<4x128xf32> -> vector<4x128xf32>
    %c0_9 = arith.constant 0 : index
    %c0_10 = arith.constant 0 : index
    %10 = vector.load %arg5[%c0_9, %c0_10] : memref<4x1xf32, #tpu.memory_space<vmem>>, vector<4x1xf32>
    %11 = vector.broadcast %10 : vector<4x1xf32> to vector<4x128xf32>
    %12 = arith.addf %9, %11 : vector<4x128xf32>
    %cst_11 = arith.constant 0.000000e+00 : f32
    %13 = vector.broadcast %cst_11 : f32 to vector<4x128xf32>
    %14 = arith.maximumf %12, %13 : vector<4x128xf32>
    %c0_12 = arith.constant 0 : index
    %c0_13 = arith.constant 0 : index
    %15 = vector.load %arg6[%c0_12, %c0_13] : memref<4x1xf32, #tpu.memory_space<vmem>>, vector<4x1xf32>
    %16 = vector.broadcast %15 : vector<4x1xf32> to vector<4x128xf32>
    %17 = arith.mulf %16, %14 : vector<4x128xf32>
    %cst_14 = arith.constant dense<0.000000e+00> : vector<128xf32>
    %18 = vector.multi_reduction <add>, %17, %cst_14 [0] : vector<4x128xf32> to vector<128xf32>
    %19 = vector.shape_cast %18 : vector<128xf32> to vector<1x128xf32>
    %c0_15 = arith.constant 0 : index
    %c0_16 = arith.constant 0 : index
    %20 = vector.load %arg7[%c0_15, %c0_16] : memref<1x1xf32, #tpu.memory_space<vmem>>, vector<1x1xf32>
    %21 = vector.broadcast %20 : vector<1x1xf32> to vector<1x128xf32>
    %22 = arith.addf %19, %21 : vector<1x128xf32>
    %23 = math.absf %22 : vector<1x128xf32>
    %cst_17 = arith.constant 0.000000e+00 : f32
    %24 = vector.broadcast %cst_17 : f32 to vector<1x128xf32>
    %25 = arith.subf %24, %23 : vector<1x128xf32>
    %26 = math.exp %25 : vector<1x128xf32>
    %cst_18 = arith.constant 1.000000e+00 : f32
    %27 = vector.broadcast %cst_18 : f32 to vector<1x128xf32>
    %28 = arith.addf %27, %26 : vector<1x128xf32>
    %cst_19 = arith.constant 1.000000e+00 : f32
    %29 = vector.broadcast %cst_19 : f32 to vector<1x128xf32>
    %30 = arith.divf %29, %28 : vector<1x128xf32>
    %cst_20 = arith.constant 0.000000e+00 : f32
    %31 = vector.broadcast %cst_20 : f32 to vector<1x128xf32>
    %32 = arith.cmpf oge, %22, %31 : vector<1x128xf32>
    %33 = arith.mulf %26, %30 : vector<1x128xf32>
    %34 = arith.select %32, %30, %33 : vector<1x128xi1>, vector<1x128xf32>
    %c0_21 = arith.constant 0 : index
    %c0_22 = arith.constant 0 : index
    %35 = vector.load %arg8[%c0_21, %c0_22] : memref<1x128xf32, #tpu.memory_space<vmem>>, vector<1x128xf32>
    tpu.vector_store %arg8[%c0_21, %c0_22], %34 {strides = array<i32>} : memref<1x128xf32, #tpu.memory_space<vmem>>, vector<1x128xf32>,
    return
  }
  func.func @transform_0(%arg0: i32) -> (i32, i32) {
    %c0_i32 = arith.constant 0 : i32
    %c0_i32_0 = arith.constant 0 : i32
    return %arg0, %c0_i32 : i32, i32
  }
  func.func @transform_1(%arg0: i32) -> (i32, i32) {
    %c0_i32 = arith.constant 0 : i32
    %c0_i32_0 = arith.constant 0 : i32
    %c0_i32_1 = arith.constant 0 : i32
    return %c0_i32, %c0_i32_0 : i32, i32
  }
  func.func @transform_2(%arg0: i32) -> (i32, i32) {
    %c0_i32 = arith.constant 0 : i32
    %c0_i32_0 = arith.constant 0 : i32
    %c0_i32_1 = arith.constant 0 : i32
    return %c0_i32, %c0_i32_0 : i32, i32
  }
  func.func @transform_3(%arg0: i32) -> (i32, i32) {
    %c0_i32 = arith.constant 0 : i32
    %c0_i32_0 = arith.constant 0 : i32
    %c0_i32_1 = arith.constant 0 : i32
    return %c0_i32, %c0_i32_0 : i32, i32
  }
  func.func @transform_4(%arg0: i32) -> (i32, i32) {
    %c0_i32 = arith.constant 0 : i32
    %c0_i32_0 = arith.constant 0 : i32
    %c0_i32_1 = arith.constant 0 : i32
    return %c0_i32, %c0_i32_0 : i32, i32
  }
  func.func @transform_5(%arg0: i32) -> (i32, i32) {
    %c0_i32 = arith.constant 0 : i32
    %c0_i32_0 = arith.constant 0 : i32
    %c0_i32_1 = arith.constant 0 : i32
    return %c0_i32, %c0_i32_0 : i32, i32
  }
  func.func @transform_6(%arg0: i32) -> (i32, i32) {
    %c0_i32 = arith.constant 0 : i32
    %c0_i32_0 = arith.constant 0 : i32
    %c0_i32_1 = arith.constant 0 : i32
    return %c0_i32, %c0_i32_0 : i32, i32
  }
  func.func @transform_7(%arg0: i32) -> (i32, i32) {
    %c0_i32 = arith.constant 0 : i32
    %c0_i32_0 = arith.constant 0 : i32
    return %c0_i32, %arg0 : i32, i32
  }
}

</mosaic_0001>

<bundles_post_ra>
// kernel: tpu_custom_call.1
= control target key start
LH: loop header
LB: loop body
LE: loop exit
PB: predicated region body
PF: predicated region fallthrough
CT: control target
= control target key end

     0   :  { %s723_s0 = inlined_call_operand.vmem [shape: f32[128,32], index: 0, kind: input, shape index: {}]   ;;  %s724_s1 = inlined_call_operand.vmem [shape: f32[32,32], index: 1, kind: input, shape index: {}]   ;;  %s725_s2 = inlined_call_operand.vmem [shape: f32[32,1], index: 2, kind: input, shape index: {}]   ;;  %s726_s3 = inlined_call_operand.vmem [shape: f32[4,32], index: 3, kind: input, shape index: {}]   ;;  %s727_s4 = inlined_call_operand.vmem [shape: f32[4,1], index: 4, kind: input, shape index: {}]   ;;  %s728_s5 = inlined_call_operand.vmem [shape: f32[4,1], index: 5, kind: input, shape index: {}]   ;;  %s729_s6 = inlined_call_operand.<no memory space> [shape: f32[1,1], index: 6, kind: input, shape index: {}]   ;;  %s730_s7 = inlined_call_operand.hbm [shape: f32[1,128], index: 7, kind: output, shape index: {}]  }
   0x1   :  { %v12_v0 = vstv %s729_s6 }
   0x2   :  { %13 = vst [vmem:[#allocation2] sm:$0x1] %v12_v0 }
   0x3   :  { %v33_v1 = vld [vmem:[%s723_s0] sm:$0xff]  ;;  %v34_v2 = vld [vmem:[%s723_s0 + $0x8] sm:$0xff]  ;;  %vm73_vm0 = vcmask 261120   ;;  %v35_v3 = vld [vmem:[%s723_s0 + $0x10] sm:$0xff]  ;;  %v539_v7 = vmov 0  }
   0x4   :  { %v450_v4 = vpack.c.bf16 %v34_v2, %v33_v1  ;;  %vm598_vm1 = vmpackc.low %vm73_vm0, %vm73_vm0  ;;  %v36_v6 = vld [vmem:[%s723_s0 + $0x18] sm:$0xff]  ;;  %509 = vset.pattern.permute.xlu0 %v539_v7  ;;  %510 = vset.pattern.permute.xlu1 %v539_v7  ;;  %v29_v9 = vld [vmem:[%s724_s1] sm:$0xff] }
   0x5   :  { %v456_v8 = vpack.c.bf16 %v36_v6, %v35_v3  ;;  %v37_v10 = vld [vmem:[%s723_s0 + $0x20] sm:$0xff]  ;;  %v38_v11 = vld [vmem:[%s723_s0 + $0x28] sm:$0xff]  ;;  %433 = vmatprep.mubr.msk.f32.mxu0 %vm73_vm0, %v29_v9  ;;  %v51_v13 = vld [vmem:[%s725_s2 + $0x10] sm:$0xff] }
   0x6   :  { %452 = vmatprep.subr.msk.bf16.mxu0 %vm598_vm1, %v450_v4  ;;  %v49_v12 = vld [vmem:[%s725_s2] sm:$0xff]  ;;  %65 = vperm.xlu1 %510, %v51_v13   ;;  %v462_v14 = vpack.c.bf16 %v38_v11, %v37_v10  ;;  %v50_v15 = vld [vmem:[%s725_s2 + $0x8] sm:$0xff] }
   0x7   :  { %455 = vmatpush3.bf16.xpose.msk.msra.mxu0 %vm598_vm1, %v450_v4  ;;  %55 = vperm.xlu0 %509, %v49_v12  }
   0x8   :  { %458 = vmatprep.subr.msk.bf16.mxu0 %vm598_vm1, %v456_v8 }
   0x9   :  { %14 = vsyncpa [#allocation4], 0  ;;  %v52_v16 = vld [vmem:[%s725_s2 + $0x18] sm:$0xff]  ;;  %v224_v17 = vld [vmem:[%s727_s4] sm:$0xf]  ;;  %v540_v38 = vmov 0.0|0.0   ;;  %v325_v2 = vlaneseq }
   0xa   :  { %70 = vperm.xlu1 %510, %v52_v16   ;;  %v39_v18 = vld [vmem:[%s723_s0 + $0x30] sm:$0xff]  ;;  %v40_v19 = vld [vmem:[%s723_s0 + $0x38] sm:$0xff]  ;;  %v304_v20 = vld [vmem:[%s728_s5] sm:$0xf]  ;;  %498 = vmatprep.subr.bf16.mxu1 %v540_v38  ;;  %vm541_vm2 = vmmov 0   ;;  %v542_v39 = vmov 0.0  }
   0xb   :  { %60 = vperm.xlu0 %509, %v50_v15   ;;  %v468_v21 = vpack.c.bf16 %v40_v19, %v39_v18  ;;  %v319_v22 = vld [vmem:[#allocation2] sm:$0x1]  ;;  %v42_v24 = vld [vmem:[%s723_s0 + $0x48] sm:$0xff]  ;;  %v43_v26 = vld [vmem:[%s723_s0 + $0x50] sm:$0xff]  ;;  %447 = vmatprep.mubr.msk.f32.mxu1 %vm541_vm2, %v542_v39  ;;  %vm311_vm3 = vcmask 1043456   ;;  %v326_v5 = vshrl.u32 %v325_v2, 7 }
   0xc   :  { %v41_v23 = vld [vmem:[%s723_s0 + $0x40] sm:$0xff]  ;;  %v44_v27 = vld [vmem:[%s723_s0 + $0x58] sm:$0xff]  ;;  %v46_v30 = vld [vmem:[%s723_s0 + $0x68] sm:$0xff] }
   0xd   :  { %v474_v25 = vpack.c.bf16 %v42_v24, %v41_v23  ;;  %v480_v28 = vpack.c.bf16 %v44_v27, %v43_v26  ;;  %v45_v29 = vld [vmem:[%s723_s0 + $0x60] sm:$0xff]  ;;  %v47_v32 = vld [vmem:[%s723_s0 + $0x70] sm:$0xff]  ;;  %v48_v33 = vld [vmem:[%s723_s0 + $0x78] sm:$0xff] }
   0xe   :  { %307 = vperm.xlu1 %510, %v304_v20   ;;  %v486_v31 = vpack.c.bf16 %v46_v30, %v45_v29  ;;  %v492_v34 = vpack.c.bf16 %v48_v33, %v47_v32  ;;  %v30_v35 = vld [vmem:[%s724_s1 + $0x8] sm:$0xff]  ;;  %v31_v36 = vld [vmem:[%s724_s1 + $0x10] sm:$0xff]  ;;  %v32_v37 = vld [vmem:[%s724_s1 + $0x18] sm:$0xff] }
   0xf   :  { %461 = vmatpush3.bf16.xpose.msk.msra.mxu0 %vm598_vm1, %v456_v8  ;;  %227 = vperm.xlu0 %509, %v224_v17   ;;  %v223_v58 = vld [vmem:[%s726_s3] sm:$0xf]  ;;  %v327_v8 = vsub.s32 0, %v326_v5  ;;  %s543_s3 = smov [#allocation3]  }
  0x10   :  { %464 = vmatprep.subr.msk.bf16.mxu0 %vm598_vm1, %v462_v14  ;;  %s347_s27 = sshll.u32 %s543_s3, 4  ;;  %s348_s27 = int_to_ptr.vmem [resolvable:$true] %s347_s27 }
  0x11   :  { %s515_s28 = scalar_lea.vmem %s348_s27, 16  ;;  %s519_s29 = scalar_lea.vmem %s348_s27, 32 }
  0x12   :  { %p516_p0 = scmp.ne.s32.totalorder %s348_s27, %s515_s28  ;;  %p520_p1 = scmp.lt.s32.totalorder %s348_s27, %s348_s27 }
  0x13   :  { %322 = vperm.xlu0 %509, %v319_v22   ;;  %p521_p2 = scmp.lt.s32.totalorder %s519_s29, %s515_s28 }
  0x15   :  { %p522_p3 = por %p521_p2, %p520_p1 }
  0x17   :  { %467 = vmatpush3.bf16.xpose.msk.msra.mxu0 %vm598_vm1, %v462_v14  ;;  %p523_p4 = pnand %p522_p3, %p516_p0 }
  0x18   :  { %470 = vmatprep.subr.msk.bf16.mxu0 %vm598_vm1, %v468_v21 }
  0x1f   :  { %473 = vmatpush3.bf16.xpose.msk.msra.mxu0 %vm598_vm1, %v468_v21 }
  0x20   :  { %476 = vmatprep.subr.msk.bf16.mxu0 %vm598_vm1, %v474_v25 }
  0x27   :  { %479 = vmatpush3.bf16.xpose.msk.msra.mxu0 %vm598_vm1, %v474_v25 }
  0x28   :  { %482 = vmatprep.subr.msk.bf16.mxu0 %vm598_vm1, %v480_v28 }
  0x2f   :  { %485 = vmatpush3.bf16.xpose.msk.msra.mxu0 %vm598_vm1, %v480_v28 }
  0x30   :  { %488 = vmatprep.subr.msk.bf16.mxu0 %vm598_vm1, %v486_v31 }
  0x37   :  { %491 = vmatpush3.bf16.xpose.msk.msra.mxu0 %vm598_vm1, %v486_v31 }
  0x38   :  { %494 = vmatprep.subr.msk.bf16.mxu0 %vm598_vm1, %v492_v34 }
  0x3f   :  { %497 = vmatpush3.bf16.xpose.msk.msra.mxu0 %vm598_vm1, %v492_v34 }
  0x46   :  { %434 = vmatmul.mubr.msk.f32.vlgmr.msra.gmra.mrb[0].mxu0 %vm73_vm0, %v30_v35 }
  0x47   :  { %436 = vmatprep.mubr.msk.f32.mxu0 %vm73_vm0, %v31_v36 }
  0x4a   :  { %437 = vmatmul.mubr.msk.f32.gmra.mrb[2].mxu0 %vm73_vm0, %v32_v37 }
  0x85   :  { %v66_v41 = vpop.permute.xlu1 %65 }
  0x86   :  { %v56_v40 = vpop.permute.xlu0 %55 }
  0x89   :  { %v71_v48 = vpop.permute.xlu1 %70 }
  0x8a   :  { %v61_v42 = vpop.permute.xlu0 %60 }
  0x8d   :  { %v308_v0 = vpop.permute.xlu1 %307 }
  0x8e   :  { %v228_v59 = vpop.permute.xlu0 %227 }
  0x92   :  { %v323_v10 = vpop.permute.xlu0 %322 }
  0x93   :  { %v328_v12 = vrot.slane %v323_v10, %v327_v8 }
 0x119   :  { %v435_v43 = vpop.f32.mrb[0].mxu0 }
 0x11a   :  { %v206_v44 = vadd.f32 %v435_v43, %v61_v42  ;;  %v200_v45 = vpop.f32.mrb[1].mxu0 }
 0x11b   :  { %v201_v46 = vadd.f32 %v200_v45, %v56_v40 }
 0x11c   :  { %v220_v47 = vmax.f32 %v206_v44, 0.0 }
 0x11d   :  { %v219_v49 = vmax.f32 %v201_v46, 0.0  ;;  %v438_v50 = vpop.f32.mrb[2].mxu0 }
 0x11e   :  { %v216_v51 = vadd.f32 %v438_v50, %v71_v48  ;;  %v210_v52 = vpop.f32.mrb[3].mxu0 }
 0x11f   :  { %v211_v53 = vadd.f32 %v210_v52, %v66_v41  ;;  %v499_v54 = vpack.c.bf16 %v220_v47, %v219_v49 }
 0x120   :  { %v222_v55 = vmax.f32 %v216_v51, 0.0 }
 0x121   :  { %v221_v56 = vmax.f32 %v211_v53, 0.0  ;;  %500 = vmatpush3.bf16.msra.mxu1 %v499_v54 }
 0x122   :  { %501 = vmatprep.subr.bf16.mxu1 %v540_v38 }
 0x123   :  { %v502_v57 = vpack.c.bf16 %v222_v55, %v221_v56 }
 0x125   :  { %503 = vmatpush3.bf16.msra.mxu1 %v502_v57 }
 0x128   :  { %448 = vmatmul.mubr.msk.f32.vlgmr.msra.gmra.mrb[0].mxu1 %vm73_vm0, %v223_v58 }
 0x1fb   :  { %v299_v60 = vpop.f32.mrb[0].mxu1 }
 0x1fc   :  { %v300_v61 = vadd.f32 %v299_v60, %v228_v59  ;;  %v449_v62 = vpop.f32.mrb[1].mxu1 }
 0x1fe   :  { %v303_v63 = vmax.f32 %v300_v61, 0.0 }
 0x200   :  { %v310_v1 = vmul.f32 %v308_v0, %v303_v63 }
 0x202   :  { %v312_v3 = vsel %vm311_vm3, %v310_v1, 0.0 }
 0x203   :  { %v313_v4 = vrot.slane %v312_v3, 4 }
 0x205   :  { %v314_v6 = vadd.f32 %v313_v4, %v312_v3 }
 0x207   :  { %v315_v7 = vrot.slane %v314_v6, 2 }
 0x209   :  { %v316_v9 = vadd.f32 %v315_v7, %v314_v6 }
 0x20b   :  { %v317_v11 = vrot.slane %v316_v9, 1 }
 0x20d   :  { %v318_v13 = vadd.f32 %v317_v11, %v316_v9 }
 0x20f   :  { %v329_v14 = vadd.f32 %v328_v12, %v318_v13 }
 0x211   :  { %v330_v15 = vand.u32 2147483647, %v329_v14  ;;  %vm337_vm4 = vcmp.ge.f32.partialorder %v329_v14, 0.0 }
 0x213   :  { %v331_v16 = vsub.f32 0.0, %v330_v15 }
 0x215   :  { %v332_v17 = vmul.f32 1.442695, %v331_v16 }
 0x217   :  { %511 = vpow2.f32 %v332_v17 }
 0x221   :  { %v512_v18 = vpop.eup %511 }
 0x222   :  { %v334_v19 = vadd.f32 1.0, %v512_v18 }
 0x224   :  { %513 = vrcp.f32 %v334_v19 }
 0x22e   :  { %v514_v20 = vpop.eup %513 }
 0x22f   :  { %v338_v21 = vmul.f32 %v514_v20, %v512_v18 }
 0x231   :  { %v339_v22 = vsel %vm337_vm4, %v514_v20, %v338_v21 }
 0x232   :  { %340 = vst [vmem:[#allocation3] sm:$0x1] %v339_v22 }
 0x233   :  { %526 = shalt.err (!%p523_p4)
}
 0x234   :  { %s527_s4 = scalar_lea.hbm %s730_s7, 16 }
 0x235   :  { %p528_p5 = scmp.ne.s32.totalorder %s730_s7, %s527_s4  ;;  %p531_p6 = scmp.lt.u32.totalorder %s527_s4, %s730_s7 }
 0x237   :  { %p533_p7 = pnand %p531_p6, %p528_p5 }
 0x239   :  { %536 = shalt.err (!%p533_p7)
}
 0x23a   :  { %350 = dma.vmem_to_hbm [thread:$0]  %s348_s27, 16, %s730_s7, [#allocation4]  }
 0x23b   :  { %537 = dma.done.wait [#allocation4], 16  }
 0x23c   :  { %538 = vsyncadd [#allocation4], 4294967280 }
 0x23d   :  { %354 = vsyncpa [#allocation4], 1 }

</bundles_post_ra>
